<compile_context>
chip_gen: v6e
topology: v6e:2x2x1
jax: 0.10.0
libtpu: 0.0.40
codegen_flags: <defaults>
</compile_context>

<pallas_src>
import functools

import numpy as np
import jax
import jax.numpy as jnp
from jax import lax
from jax.experimental import pallas as pl
from jax.experimental.pallas import tpu as pltpu


# ----------------------------------------------------------------------------
# Pallas kernel: full XBlock forward, whole batch in one invocation.
# Shapes inside: x (N, Ci, P) with P = H*W; compute on (C, N*P).
# ----------------------------------------------------------------------------
def xblock_kernel(x_ref, s1_ref, b1_ref, w1_ref, b2_ref, w2_ref, b3_ref,
                  w30_ref, m_ref, out_ref, *, H, W):
    N, Ci, P = x_ref.shape
    Co = w1_ref.shape[0]
    NP = N * P

    # Fold batch into the lane (pixel) axis: (Ci, N*P). Lane-axis concat of
    # 256-wide (lane-tile aligned) pieces is essentially free.
    x = jnp.concatenate([x_ref[n] for n in range(N)], axis=-1)

    # --- bn1 + relu1 (per-channel scale/shift broadcast over lanes) ----------
    h = jnp.maximum(x * s1_ref[...] + b1_ref[...], 0.0)            # (Ci, NP)

    # --- conv1 (1x1) with bn2 scale pre-folded, then bn2 shift + relu2 -------
    h = jnp.dot(w1_ref[...], h, preferred_element_type=jnp.float32)  # (Co, NP)
    h = jnp.maximum(h + b2_ref[...], 0.0)

    # --- conv2: grouped 3x3, stride 1, pad 1 ----------------------------------
    # Nine taps as lane rotations (XLU) masked at image boundaries, stacked
    # along the contraction axis -> ONE matmul with K = 9*Co.
    taps = []
    t = 0
    for dy in (-1, 0, 1):
        for dx in (-1, 0, 1):
            off = dy * W + dx
            if off == 0:
                taps.append(h)
            else:
                shifted = pltpu.roll(h, (-off) % NP, axis=1)
                taps.append(shifted * m_ref[t])                    # (Co, NP)
            t += 1
    im2col = jnp.concatenate(taps, axis=0)                         # (9*Co, NP)
    h = jnp.dot(w2_ref[...], im2col,
                preferred_element_type=jnp.float32)                # (Co, NP)

    # --- bn3 shift + relu3 (bn3 scale folded into w2) -------------------------
    h = jnp.maximum(h + b3_ref[...], 0.0)

    # --- conv3 (1x1) + shortcut conv0 (1x1 on raw x) fused into one matmul ----
    cat = jnp.concatenate([h, x], axis=0)                          # (Co+Ci, NP)
    out = jnp.dot(w30_ref[...], cat,
                  preferred_element_type=jnp.float32)              # (Co, NP)

    # Split the lane axis back into the batch dimension (256-aligned slices).
    for n in range(N):
        out_ref[n] = out[:, n * P:(n + 1) * P]


# ----------------------------------------------------------------------------
# Wrapper: NCHW in/out (only free reshapes), pallas_call plumbing.
# ----------------------------------------------------------------------------
def xblock_forward(x_nchw, params):
    N, Ci, H, W = x_nchw.shape
    Co = params["w1f"].shape[0]
    P = H * W
    NP = N * P

    x = x_nchw.reshape(N, Ci, P).astype(jnp.float32)   # free reshape (no transpose)

    # Precompute the nine boundary masks (host-side, tiny constant input).
    q = np.arange(NP)
    yy = (q % P) // W
    xx = q % W
    masks = np.zeros((9, 1, NP), np.float32)
    t = 0
    for dy in (-1, 0, 1):
        for dx in (-1, 0, 1):
            valid = ((yy + dy >= 0) & (yy + dy < H) &
                     (xx + dx >= 0) & (xx + dx < W))
            masks[t, 0, :] = valid.astype(np.float32)
            t += 1
    masks = jnp.asarray(masks)

    def _full_spec(shape):
        zeros = (0,) * len(shape)
        return pl.BlockSpec(shape, lambda i, _z=zeros: _z)

    kernel = functools.partial(xblock_kernel, H=H, W=W)

    out = pl.pallas_call(
        kernel,
        out_shape=jax.ShapeDtypeStruct((N, Co, P), jnp.float32),
        grid=(1,),
        in_specs=[
            _full_spec((N, Ci, P)),        # x
            _full_spec((Ci, 1)),           # bn1 scale
            _full_spec((Ci, 1)),           # bn1 shift
            _full_spec((Co, Ci)),          # conv1 weight (bn2 scale folded)
            _full_spec((Co, 1)),           # bn2 shift
            _full_spec((Co, 9 * Co)),      # conv2 packed weight (bn3 scale folded)
            _full_spec((Co, 1)),           # bn3 shift
            _full_spec((Co, Co + Ci)),     # [conv3 | conv0] stacked weight
            _full_spec((9, 1, NP)),        # boundary masks
        ],
        out_specs=_full_spec((N, Co, P)),
        compiler_params=pltpu.CompilerParams(
            dimension_semantics=("arbitrary",)),
    )(x,
      params["s1"], params["b1"], params["w1f"], params["b2"],
      params["w2p"], params["b3"], params["w30"], masks)

    return out.reshape(N, Co, H, W)        # free reshape back to NCHW


# ----------------------------------------------------------------------------
# Parameter construction (shapes match XBlock(Ni=8, No=16, G=8))
# ----------------------------------------------------------------------------
def make_params(key, Ni, No, G):
    ks = jax.random.split(key, 7)
    Cg = No // G
    # PyTorch-format conv weights (OIHW)
    w0_pt = jax.random.normal(ks[0], (No, Ni, 1, 1), jnp.float32) * 0.1
    w1_pt = jax.random.normal(ks[1], (No, Ni, 1, 1), jnp.float32) * 0.1
    w2_pt = jax.random.normal(ks[2], (No, Cg, 3, 3), jnp.float32) * 0.1
    w3_pt = jax.random.normal(ks[3], (No, No, 1, 1), jnp.float32) * 0.1

    def bn_params(k, C):
        k1, k2, k3, k4 = jax.random.split(k, 4)
        gamma = jax.random.normal(k1, (C,), jnp.float32) * 0.1 + 1.0
        beta = jax.random.normal(k2, (C,), jnp.float32) * 0.1
        mean = jax.random.normal(k3, (C,), jnp.float32) * 0.1
        var = jnp.abs(jax.random.normal(k4, (C,), jnp.float32)) * 0.1 + 0.5
        return gamma, beta, mean, var

    bn1 = bn_params(ks[4], Ni)
    bn2 = bn_params(ks[5], No)
    bn3 = bn_params(ks[6], No)

    def fold(bn):
        gamma, beta, mean, var = bn
        s = gamma / jnp.sqrt(var + 1e-5)
        b = beta - mean * s
        return s, b

    s1, b1 = fold(bn1)
    s2, b2 = fold(bn2)
    s3, b3 = fold(bn3)

    # conv1 (Co, Ci) with bn2 scale folded into output rows.
    w1f = w1_pt[:, :, 0, 0] * s2[:, None]

    # conv2: grouped 3x3 packed as (Co, 9*Co) block-diagonal weight, tap-major,
    # with bn3 scale folded into output rows.
    w2_np = np.asarray(w2_pt)
    w2p = np.zeros((No, 9 * No), np.float32)
    for co in range(No):
        g = co // Cg
        for ky in range(3):
            for kx in range(3):
                t = ky * 3 + kx
                w2p[co, t * No + g * Cg:t * No + g * Cg + Cg] = w2_np[co, :, ky, kx]
    w2p = jnp.asarray(w2p) * s3[:, None]

    # conv3 and shortcut conv0 stacked along the contraction dim -> (Co, Co+Ci)
    w30 = jnp.concatenate([w3_pt[:, :, 0, 0], w0_pt[:, :, 0, 0]], axis=1)

    params = dict(
        s1=s1.reshape(Ni, 1), b1=b1.reshape(Ni, 1),
        b2=b2.reshape(No, 1), b3=b3.reshape(No, 1),
        w1f=w1f, w2p=w2p, w30=w30,
        # keep PyTorch-format copies / raw stats for the pure-JAX reference
        w0_pt=w0_pt, w1_pt=w1_pt, w2_pt=w2_pt, w3_pt=w3_pt,
        bn1=bn1, bn2=bn2, bn3=bn3, G=G,
    )
    return params


# ----------------------------------------------------------------------------
# Pure-JAX reference (mirrors the PyTorch forward, inference-mode BN)
# ----------------------------------------------------------------------------
def ref_forward(x, p):
    def bn(x, stats):
        gamma, beta, mean, var = stats
        inv = gamma / jnp.sqrt(var + 1e-5)
        return x * inv[None, :, None, None] + (beta - mean * inv)[None, :, None, None]

    def conv(x, w, pad="VALID", groups=1):
        return lax.conv_general_dilated(
            x, w, (1, 1), pad,
            dimension_numbers=("NCHW", "OIHW", "NCHW"),
            feature_group_count=groups)

    res = jax.nn.relu(bn(x, p["bn1"]))
    res = conv(res, p["w1_pt"])
    res = jax.nn.relu(bn(res, p["bn2"]))
    res = conv(res, p["w2_pt"], pad=((1, 1), (1, 1)), groups=p["G"])
    res = jax.nn.relu(bn(res, p["bn3"]))
    res = conv(res, p["w3_pt"])
    shortcut = conv(x, p["w0_pt"])
    return shortcut + res


if __name__ == "__main__":
    N, Ni, No, H, W, G = 2, 8, 16, 16, 16, 8

    key = jax.random.PRNGKey(0)
    kx, kp = jax.random.split(key)
    x = jax.random.normal(kx, (N, Ni, H, W), jnp.float32)
    params = make_params(kp, Ni, No, G)

    out = jax.block_until_ready(xblock_forward(x, params))
    ref = jax.block_until_ready(ref_forward(x, params))

    np.testing.assert_allclose(np.asarray(out), np.asarray(ref),
                               rtol=1e-4, atol=1e-4)
    print("KERNEL_OK")
</pallas_src>

<mosaic_0001>
module attributes {stable_mosaic.version = 11 : i64} {
  func.func @xblock_kernel(%arg0: i32, %arg1: memref<2x8x256xf32, #tpu.memory_space<vmem>>, %arg2: memref<8x1xf32, #tpu.memory_space<vmem>>, %arg3: memref<8x1xf32, #tpu.memory_space<vmem>>, %arg4: memref<16x8xf32, #tpu.memory_space<vmem>>, %arg5: memref<16x1xf32, #tpu.memory_space<vmem>>, %arg6: memref<16x144xf32, #tpu.memory_space<vmem>>, %arg7: memref<16x1xf32, #tpu.memory_space<vmem>>, %arg8: memref<16x24xf32, #tpu.memory_space<vmem>>, %arg9: memref<9x1x512xf32, #tpu.memory_space<vmem>>, %arg10: memref<2x16x256xf32, #tpu.memory_space<vmem>>) attributes {dimension_semantics = [#tpu.dimension_semantics<arbitrary>], iteration_bounds = array<i64: 1>, scalar_prefetch = 0 : i64, scratch_operands = 0 : i64, tpu.core_type = #tpu.core_type<tc>, window_params = [{pipeline_mode = #tpu.pipeline_mode<synchronous>, transform_indices = @transform_0, window_bounds = array<i64: 2, 8, 256>}, {pipeline_mode = #tpu.pipeline_mode<synchronous>, transform_indices = @transform_1, window_bounds = array<i64: 8, 1>}, {pipeline_mode = #tpu.pipeline_mode<synchronous>, transform_indices = @transform_2, window_bounds = array<i64: 8, 1>}, {pipeline_mode = #tpu.pipeline_mode<synchronous>, transform_indices = @transform_3, window_bounds = array<i64: 16, 8>}, {pipeline_mode = #tpu.pipeline_mode<synchronous>, transform_indices = @transform_4, window_bounds = array<i64: 16, 1>}, {pipeline_mode = #tpu.pipeline_mode<synchronous>, transform_indices = @transform_5, window_bounds = array<i64: 16, 144>}, {pipeline_mode = #tpu.pipeline_mode<synchronous>, transform_indices = @transform_6, window_bounds = array<i64: 16, 1>}, {pipeline_mode = #tpu.pipeline_mode<synchronous>, transform_indices = @transform_7, window_bounds = array<i64: 16, 24>}, {pipeline_mode = #tpu.pipeline_mode<synchronous>, transform_indices = @transform_8, window_bounds = array<i64: 9, 1, 512>}, {pipeline_mode = #tpu.pipeline_mode<synchronous>, transform_indices = @transform_9, window_bounds = array<i64: 2, 16, 256>}]} {
    %c0 = arith.constant 0 : index
    %c0_0 = arith.constant 0 : index
    %c0_1 = arith.constant 0 : index
    %0 = vector.load %arg1[%c0, %c0_0, %c0_1] : memref<2x8x256xf32, #tpu.memory_space<vmem>>, vector<1x8x256xf32>
    %1 = vector.shape_cast %0 : vector<1x8x256xf32> to vector<8x256xf32>
    %c1 = arith.constant 1 : index
    %c0_2 = arith.constant 0 : index
    %c0_3 = arith.constant 0 : index
    %2 = vector.load %arg1[%c1, %c0_2, %c0_3] : memref<2x8x256xf32, #tpu.memory_space<vmem>>, vector<1x8x256xf32>
    %3 = vector.shape_cast %2 : vector<1x8x256xf32> to vector<8x256xf32>
    %4 = tpu.concatenate %1, %3 in 1 : vector<8x256xf32>, vector<8x256xf32> -> vector<8x512xf32>
    %c0_4 = arith.constant 0 : index
    %c0_5 = arith.constant 0 : index
    %5 = vector.load %arg2[%c0_4, %c0_5] : memref<8x1xf32, #tpu.memory_space<vmem>>, vector<8x1xf32>
    %6 = vector.broadcast %5 : vector<8x1xf32> to vector<8x512xf32>
    %7 = arith.mulf %4, %6 : vector<8x512xf32>
    %c0_6 = arith.constant 0 : index
    %c0_7 = arith.constant 0 : index
    %8 = vector.load %arg3[%c0_6, %c0_7] : memref<8x1xf32, #tpu.memory_space<vmem>>, vector<8x1xf32>
    %9 = vector.broadcast %8 : vector<8x1xf32> to vector<8x512xf32>
    %10 = arith.addf %7, %9 : vector<8x512xf32>
    %cst = arith.constant 0.000000e+00 : f32
    %11 = vector.broadcast %cst : f32 to vector<8x512xf32>
    %12 = arith.maximumf %10, %11 : vector<8x512xf32>
    %c0_8 = arith.constant 0 : index
    %c0_9 = arith.constant 0 : index
    %13 = vector.load %arg4[%c0_8, %c0_9] : memref<16x8xf32, #tpu.memory_space<vmem>>, vector<16x8xf32>
    %cst_10 = arith.constant dense<0.000000e+00> : vector<16x512xf32>
    %14 = tpu.matmul %13, %12, %cst_10 {dimension_numbers = #tpu.dot_dimension_numbers<[1], [0], [0], [1], [0, 0, 1, 1], [], []>} : vector<16x8xf32>, vector<8x512xf32>, vector<16x512xf32> -> vector<16x512xf32>
    %c0_11 = arith.constant 0 : index
    %c0_12 = arith.constant 0 : index
    %15 = vector.load %arg5[%c0_11, %c0_12] : memref<16x1xf32, #tpu.memory_space<vmem>>, vector<16x1xf32>
    %16 = vector.broadcast %15 : vector<16x1xf32> to vector<16x512xf32>
    %17 = arith.addf %14, %16 : vector<16x512xf32>
    %cst_13 = arith.constant 0.000000e+00 : f32
    %18 = vector.broadcast %cst_13 : f32 to vector<16x512xf32>
    %19 = arith.maximumf %17, %18 : vector<16x512xf32>
    %c17_i32 = arith.constant 17 : i32
    %20 = tpu.dynamic_rotate %19 by %c17_i32 dim 1 : vector<16x512xf32>, i32 -> vector<16x512xf32>
    %c0_14 = arith.constant 0 : index
    %c0_15 = arith.constant 0 : index
    %c0_16 = arith.constant 0 : index
    %21 = vector.load %arg9[%c0_14, %c0_15, %c0_16] : memref<9x1x512xf32, #tpu.memory_space<vmem>>, vector<1x1x512xf32>
    %22 = vector.shape_cast %21 : vector<1x1x512xf32> to vector<1x512xf32>
    %23 = vector.broadcast %22 : vector<1x512xf32> to vector<16x512xf32>
    %24 = arith.mulf %20, %23 : vector<16x512xf32>
    %c16_i32 = arith.constant 16 : i32
    %25 = tpu.dynamic_rotate %19 by %c16_i32 dim 1 : vector<16x512xf32>, i32 -> vector<16x512xf32>
    %c1_17 = arith.constant 1 : index
    %c0_18 = arith.constant 0 : index
    %c0_19 = arith.constant 0 : index
    %26 = vector.load %arg9[%c1_17, %c0_18, %c0_19] : memref<9x1x512xf32, #tpu.memory_space<vmem>>, vector<1x1x512xf32>
    %27 = vector.shape_cast %26 : vector<1x1x512xf32> to vector<1x512xf32>
    %28 = vector.broadcast %27 : vector<1x512xf32> to vector<16x512xf32>
    %29 = arith.mulf %25, %28 : vector<16x512xf32>
    %c15_i32 = arith.constant 15 : i32
    %30 = tpu.dynamic_rotate %19 by %c15_i32 dim 1 : vector<16x512xf32>, i32 -> vector<16x512xf32>
    %c2 = arith.constant 2 : index
    %c0_20 = arith.constant 0 : index
    %c0_21 = arith.constant 0 : index
    %31 = vector.load %arg9[%c2, %c0_20, %c0_21] : memref<9x1x512xf32, #tpu.memory_space<vmem>>, vector<1x1x512xf32>
    %32 = vector.shape_cast %31 : vector<1x1x512xf32> to vector<1x512xf32>
    %33 = vector.broadcast %32 : vector<1x512xf32> to vector<16x512xf32>
    %34 = arith.mulf %30, %33 : vector<16x512xf32>
    %c1_i32 = arith.constant 1 : i32
    %35 = tpu.dynamic_rotate %19 by %c1_i32 dim 1 : vector<16x512xf32>, i32 -> vector<16x512xf32>
    %c3 = arith.constant 3 : index
    %c0_22 = arith.constant 0 : index
    %c0_23 = arith.constant 0 : index
    %36 = vector.load %arg9[%c3, %c0_22, %c0_23] : memref<9x1x512xf32, #tpu.memory_space<vmem>>, vector<1x1x512xf32>
    %37 = vector.shape_cast %36 : vector<1x1x512xf32> to vector<1x512xf32>
    %38 = vector.broadcast %37 : vector<1x512xf32> to vector<16x512xf32>
    %39 = arith.mulf %35, %38 : vector<16x512xf32>
    %c511_i32 = arith.constant 511 : i32
    %40 = tpu.dynamic_rotate %19 by %c511_i32 dim 1 : vector<16x512xf32>, i32 -> vector<16x512xf32>
    %c5 = arith.constant 5 : index
    %c0_24 = arith.constant 0 : index
    %c0_25 = arith.constant 0 : index
    %41 = vector.load %arg9[%c5, %c0_24, %c0_25] : memref<9x1x512xf32, #tpu.memory_space<vmem>>, vector<1x1x512xf32>
    %42 = vector.shape_cast %41 : vector<1x1x512xf32> to vector<1x512xf32>
    %43 = vector.broadcast %42 : vector<1x512xf32> to vector<16x512xf32>
    %44 = arith.mulf %40, %43 : vector<16x512xf32>
    %c497_i32 = arith.constant 497 : i32
    %45 = tpu.dynamic_rotate %19 by %c497_i32 dim 1 : vector<16x512xf32>, i32 -> vector<16x512xf32>
    %c6 = arith.constant 6 : index
    %c0_26 = arith.constant 0 : index
    %c0_27 = arith.constant 0 : index
    %46 = vector.load %arg9[%c6, %c0_26, %c0_27] : memref<9x1x512xf32, #tpu.memory_space<vmem>>, vector<1x1x512xf32>
    %47 = vector.shape_cast %46 : vector<1x1x512xf32> to vector<1x512xf32>
    %48 = vector.broadcast %47 : vector<1x512xf32> to vector<16x512xf32>
    %49 = arith.mulf %45, %48 : vector<16x512xf32>
    %c496_i32 = arith.constant 496 : i32
    %50 = tpu.dynamic_rotate %19 by %c496_i32 dim 1 : vector<16x512xf32>, i32 -> vector<16x512xf32>
    %c7 = arith.constant 7 : index
    %c0_28 = arith.constant 0 : index
    %c0_29 = arith.constant 0 : index
    %51 = vector.load %arg9[%c7, %c0_28, %c0_29] : memref<9x1x512xf32, #tpu.memory_space<vmem>>, vector<1x1x512xf32>
    %52 = vector.shape_cast %51 : vector<1x1x512xf32> to vector<1x512xf32>
    %53 = vector.broadcast %52 : vector<1x512xf32> to vector<16x512xf32>
    %54 = arith.mulf %50, %53 : vector<16x512xf32>
    %c495_i32 = arith.constant 495 : i32
    %55 = tpu.dynamic_rotate %19 by %c495_i32 dim 1 : vector<16x512xf32>, i32 -> vector<16x512xf32>
    %c8 = arith.constant 8 : index
    %c0_30 = arith.constant 0 : index
    %c0_31 = arith.constant 0 : index
    %56 = vector.load %arg9[%c8, %c0_30, %c0_31] : memref<9x1x512xf32, #tpu.memory_space<vmem>>, vector<1x1x512xf32>
    %57 = vector.shape_cast %56 : vector<1x1x512xf32> to vector<1x512xf32>
    %58 = vector.broadcast %57 : vector<1x512xf32> to vector<16x512xf32>
    %59 = arith.mulf %55, %58 : vector<16x512xf32>
    %60 = tpu.concatenate %24, %29, %34, %39, %19, %44, %49, %54, %59 in 0 : vector<16x512xf32>, vector<16x512xf32>, vector<16x512xf32>, vector<16x512xf32>, vector<16x512xf32>, vector<16x512xf32>, vector<16x512xf32>, vector<16x512xf32>, vector<16x512xf32> -> vector<144x512xf32>
    %c0_32 = arith.constant 0 : index
    %c0_33 = arith.constant 0 : index
    %61 = vector.load %arg6[%c0_32, %c0_33] : memref<16x144xf32, #tpu.memory_space<vmem>>, vector<16x144xf32>
    %cst_34 = arith.constant dense<0.000000e+00> : vector<16x512xf32>
    %62 = tpu.matmul %61, %60, %cst_34 {dimension_numbers = #tpu.dot_dimension_numbers<[1], [0], [0], [1], [0, 0, 1, 1], [], []>} : vector<16x144xf32>, vector<144x512xf32>, vector<16x512xf32> -> vector<16x512xf32>
    %c0_35 = arith.constant 0 : index
    %c0_36 = arith.constant 0 : index
    %63 = vector.load %arg7[%c0_35, %c0_36] : memref<16x1xf32, #tpu.memory_space<vmem>>, vector<16x1xf32>
    %64 = vector.broadcast %63 : vector<16x1xf32> to vector<16x512xf32>
    %65 = arith.addf %62, %64 : vector<16x512xf32>
    %cst_37 = arith.constant 0.000000e+00 : f32
    %66 = vector.broadcast %cst_37 : f32 to vector<16x512xf32>
    %67 = arith.maximumf %65, %66 : vector<16x512xf32>
    %68 = tpu.concatenate %67, %4 in 0 : vector<16x512xf32>, vector<8x512xf32> -> vector<24x512xf32>
    %c0_38 = arith.constant 0 : index
    %c0_39 = arith.constant 0 : index
    %69 = vector.load %arg8[%c0_38, %c0_39] : memref<16x24xf32, #tpu.memory_space<vmem>>, vector<16x24xf32>
    %cst_40 = arith.constant dense<0.000000e+00> : vector<16x512xf32>
    %70 = tpu.matmul %69, %68, %cst_40 {dimension_numbers = #tpu.dot_dimension_numbers<[1], [0], [0], [1], [0, 0, 1, 1], [], []>} : vector<16x24xf32>, vector<24x512xf32>, vector<16x512xf32> -> vector<16x512xf32>
    %71 = vector.extract_strided_slice %70 {offsets = [0, 0], sizes = [16, 256], strides = [1, 1]} : vector<16x512xf32> to vector<16x256xf32>
    %c0_41 = arith.constant 0 : index
    %c0_42 = arith.constant 0 : index
    %c0_43 = arith.constant 0 : index
    %72 = vector.load %arg10[%c0_41, %c0_42, %c0_43] : memref<2x16x256xf32, #tpu.memory_space<vmem>>, vector<1x16x256xf32>
    %73 = vector.shape_cast %72 : vector<1x16x256xf32> to vector<16x256xf32>
    %74 = vector.shape_cast %71 : vector<16x256xf32> to vector<1x16x256xf32>
    tpu.vector_store %arg10[%c0_41, %c0_42, %c0_43], %74 {strides = array<i32>} : memref<2x16x256xf32, #tpu.memory_space<vmem>>, vector<1x16x256xf32>,
    %75 = vector.extract_strided_slice %70 {offsets = [0, 256], sizes = [16, 256], strides = [1, 1]} : vector<16x512xf32> to vector<16x256xf32>
    %c1_44 = arith.constant 1 : index
    %c0_45 = arith.constant 0 : index
    %c0_46 = arith.constant 0 : index
    %76 = vector.load %arg10[%c1_44, %c0_45, %c0_46] : memref<2x16x256xf32, #tpu.memory_space<vmem>>, vector<1x16x256xf32>
    %77 = vector.shape_cast %76 : vector<1x16x256xf32> to vector<16x256xf32>
    %78 = vector.shape_cast %75 : vector<16x256xf32> to vector<1x16x256xf32>
    tpu.vector_store %arg10[%c1_44, %c0_45, %c0_46], %78 {strides = array<i32>} : memref<2x16x256xf32, #tpu.memory_space<vmem>>, vector<1x16x256xf32>,
    return
  }
  func.func @transform_0(%arg0: i32) -> (i32, i32, i32) {
    %c0_i32 = arith.constant 0 : i32
    %c0_i32_0 = arith.constant 0 : i32
    %c0_i32_1 = arith.constant 0 : i32
    %c0_i32_2 = arith.constant 0 : i32
    return %c0_i32, %c0_i32_0, %c0_i32_1 : i32, i32, i32
  }
  func.func @transform_1(%arg0: i32) -> (i32, i32) {
    %c0_i32 = arith.constant 0 : i32
    %c0_i32_0 = arith.constant 0 : i32
    %c0_i32_1 = arith.constant 0 : i32
    return %c0_i32, %c0_i32_0 : i32, i32
  }
  func.func @transform_2(%arg0: i32) -> (i32, i32) {
    %c0_i32 = arith.constant 0 : i32
    %c0_i32_0 = arith.constant 0 : i32
    %c0_i32_1 = arith.constant 0 : i32
    return %c0_i32, %c0_i32_0 : i32, i32
  }
  func.func @transform_3(%arg0: i32) -> (i32, i32) {
    %c0_i32 = arith.constant 0 : i32
    %c0_i32_0 = arith.constant 0 : i32
    %c0_i32_1 = arith.constant 0 : i32
    return %c0_i32, %c0_i32_0 : i32, i32
  }
  func.func @transform_4(%arg0: i32) -> (i32, i32) {
    %c0_i32 = arith.constant 0 : i32
    %c0_i32_0 = arith.constant 0 : i32
    %c0_i32_1 = arith.constant 0 : i32
    return %c0_i32, %c0_i32_0 : i32, i32
  }
  func.func @transform_5(%arg0: i32) -> (i32, i32) {
    %c0_i32 = arith.constant 0 : i32
    %c0_i32_0 = arith.constant 0 : i32
    %c0_i32_1 = arith.constant 0 : i32
    return %c0_i32, %c0_i32_0 : i32, i32
  }
  func.func @transform_6(%arg0: i32) -> (i32, i32) {
    %c0_i32 = arith.constant 0 : i32
    %c0_i32_0 = arith.constant 0 : i32
    %c0_i32_1 = arith.constant 0 : i32
    return %c0_i32, %c0_i32_0 : i32, i32
  }
  func.func @transform_7(%arg0: i32) -> (i32, i32) {
    %c0_i32 = arith.constant 0 : i32
    %c0_i32_0 = arith.constant 0 : i32
    %c0_i32_1 = arith.constant 0 : i32
    return %c0_i32, %c0_i32_0 : i32, i32
  }
  func.func @transform_8(%arg0: i32) -> (i32, i32, i32) {
    %c0_i32 = arith.constant 0 : i32
    %c0_i32_0 = arith.constant 0 : i32
    %c0_i32_1 = arith.constant 0 : i32
    %c0_i32_2 = arith.constant 0 : i32
    return %c0_i32, %c0_i32_0, %c0_i32_1 : i32, i32, i32
  }
  func.func @transform_9(%arg0: i32) -> (i32, i32, i32) {
    %c0_i32 = arith.constant 0 : i32
    %c0_i32_0 = arith.constant 0 : i32
    %c0_i32_1 = arith.constant 0 : i32
    %c0_i32_2 = arith.constant 0 : i32
    return %c0_i32, %c0_i32_0, %c0_i32_1 : i32, i32, i32
  }
}

</mosaic_0001>

<bundles_post_ra>
// kernel: tpu_custom_call.1
= control target key start
LH: loop header
LB: loop body
LE: loop exit
PB: predicated region body
PF: predicated region fallthrough
CT: control target
= control target key end

     0   :  { %14 = vsyncpa [#allocation3], 0  ;;  %s1800_s0 = inlined_call_operand.vmem [shape: f32[2,8,256], index: 0, kind: input, shape index: {}]   ;;  %s1801_s1 = inlined_call_operand.vmem [shape: f32[8,1], index: 1, kind: input, shape index: {}]   ;;  %s1802_s2 = inlined_call_operand.vmem [shape: f32[8,1], index: 2, kind: input, shape index: {}]   ;;  %s1803_s3 = inlined_call_operand.vmem [shape: f32[16,8], index: 3, kind: input, shape index: {}]   ;;  %s1804_s4 = inlined_call_operand.vmem [shape: f32[16,1], index: 4, kind: input, shape index: {}]   ;;  %s1805_s5 = inlined_call_operand.hbm [shape: f32[16,144], index: 5, kind: input, shape index: {}]   ;;  %s1806_s6 = inlined_call_operand.vmem [shape: f32[16,1], index: 6, kind: input, shape index: {}]   ;;  %s1807_s7 = inlined_call_operand.vmem [shape: f32[16,24], index: 7, kind: input, shape index: {}]   ;;  %s1808_s8 = inlined_call_operand.vmem [shape: f32[9,1,512], index: 8, kind: input, shape index: {}]   ;;  %s1809_s9 = inlined_call_operand.hbm [shape: f32[2,16,256], index: 9, kind: output, shape index: {}]  }
   0x1   :  { %15 = vsyncpa [#allocation4], 0  ;;  %s1162_s30 = smov [#allocation2]  }
   0x2   :  { %s31_s10 = sshll.u32 %s1162_s30, 4  ;;  %s32_s10 = int_to_ptr.vmem [resolvable:$true] %s31_s10 }
   0x3   :  { %s1126_s11 = scalar_lea.vmem %s32_s10, 512  ;;  %p1131_p1 = scmp.lt.s32.totalorder %s32_s10, %s32_s10 }
   0x4   :  { %p1127_p0 = scmp.ne.s32.totalorder %s32_s10, %s1126_s11  ;;  %p1132_p2 = scmp.lt.s32.totalorder %s1126_s11, %s1126_s11 }
   0x6   :  { %p1133_p3 = por %p1132_p2, %p1131_p1 }
   0x8   :  { %p1134_p4 = pnand %p1133_p3, %p1127_p0 }
   0xa   :  { %1137 = shalt.err (!%p1134_p4)
}
   0xb   :  { %s1163_s12 = smov 256   ;;  %s1164_s13 = smov 16  }
   0xc   :  { %37 = dma.hbm_to_vmem [thread:$0]  %s1805_s5, 512, %s32_s10, [#allocation3], %s1163_s12, %s1163_s12, %s1164_s13  }
   0xd   :  { %1158 = dma.done.wait [#allocation3], 512  }
   0xe   :  { %1159 = vsyncadd [#allocation3], 4294966784  ;;  %v1165_v0 = vmov 0   ;;  %v52_v1 = vld [vmem:[%s1801_s1] sm:$0xff]  ;;  %v1810_v3 = vmov 0.0   ;;  %v79_v4 = vld [vmem:[%s1804_s4 + $0x8] sm:$0xff]  ;;  %v275_v52 = vlaneseq }
   0xf   :  { %1116 = vset.pattern.permute.xlu0 %v1165_v0  ;;  %1117 = vset.pattern.permute.xlu1 %v1165_v0  ;;  %v62_v2 = vld [vmem:[%s1802_s2] sm:$0xff]  ;;  %v1248_v6 = vld [vmem:[%s1800_s0 + $0x8] sm:$0xff]  ;;  %v1253_v8 = vld [vmem:[%s1800_s0 + $0x18] sm:$0xff]  ;;  %vm90_vm0 = vcmask 64512   ;;  %s1167_s10 = smov 112   ;;  %s1169_s11 = smov 127  }
  0x10   :  { %55 = vperm.xlu0 %1116, %v52_v1   ;;  %161 = vmatprep.mubr.f32.mxu0 %v1810_v3  ;;  %v78_v5 = vld [vmem:[%s1804_s4] sm:$0xff]  ;;  %1819 = vst [vmem:[#allocation8_spill] sm:$0xff] %v1248_v6  ;;  %1820 = vst [vmem:[#allocation9_spill] sm:$0xff] %v1253_v8  ;;  %v1263_v10 = vld [vmem:[%s1800_s0 + $0x10] sm:$0xff]  ;;  %s1170_s14 = smov 1   ;;  %s1171_s15 = smov 15  }
  0x11   :  { %238 = vmatprep.mubr.f32.mxu1 %v1810_v3  ;;  %87 = vperm.xlu1 %1117, %v79_v4   ;;  %v1258_v9 = vld [vmem:[%s1800_s0] sm:$0xff]  ;;  %1822 = vst [vmem:[#allocation11_spill] sm:$0xff] %v1263_v10  ;;  %v77_v25 = vld [vmem:[%s1803_s3 + $0x8] sm:$0xff]  ;;  %s1172_s16 = smov 17   ;;  %s1173_s17 = smov 111   ;;  %v1406_v53 = vand.u32 127, %v275_v52 }
  0x12   :  { %1821 = vst [vmem:[#allocation10_spill] sm:$0xff] %v1258_v9  ;;  %v76_v24 = vld [vmem:[%s1803_s3] sm:$0xff]  ;;  %s1168_s3 = smov 113   ;;  %v709_v55 = vld [vmem:[#allocation2 + $0x8] sm:$0xff]  ;;  %vm724_vm2 = vcmask 130048   ;;  %vm895_vm10 = vcmask 195584  }
  0x13   :  { %vm612_vm1 = vcmp.lt.s32.totalorder %v1406_v53, 112  ;;  %vm556_vm3 = vcmp.lt.s32.totalorder %v1406_v53, 113  ;;  %v713_v63 = vld [vmem:[%s1806_s6 + $0x8] sm:$0xff]  ;;  %v712_v1 = vld [vmem:[%s1806_s6] sm:$0xff]  ;;  %vm500_vm4 = vcmp.lt.s32.totalorder %v1406_v53, 127  ;;  %vm444_vm5 = vcmp.lt.s32.totalorder %v1406_v53, 1 }
  0x14   :  { %65 = vperm.xlu0 %1116, %v62_v2   ;;  %vm388_vm6 = vcmp.lt.s32.totalorder %v1406_v53, 15  ;;  %vm332_vm7 = vcmp.lt.s32.totalorder %v1406_v53, 16  ;;  %vm277_vm8 = vcmp.lt.s32.totalorder %v1406_v53, 17  ;;  %vm668_vm9 = vcmp.lt.s32.totalorder %v1406_v53, 111 }
  0x15   :  { %82 = vperm.xlu1 %1117, %v78_v5  }
  0x19   :  { %v1834_v53 = vld [vmem:[#allocation10_spill] sm:$0xff] }
  0x8b   :  { %v56_v7 = vpop.permute.xlu0 %55 }
  0x8c   :  { %v59_v11 = vmul.f32 %v56_v7, %v1248_v6  ;;  %v61_v12 = vmul.f32 %v1253_v8, %v56_v7  ;;  %v58_v13 = vmul.f32 %v56_v7, %v1258_v9  ;;  %v60_v14 = vmul.f32 %v1263_v10, %v56_v7  ;;  %v88_v26 = vpop.permute.xlu1 %87 }
  0x8f   :  { %v66_v15 = vpop.permute.xlu0 %65 }
  0x90   :  { %v69_v16 = vadd.f32 %v66_v15, %v59_v11  ;;  %v71_v17 = vadd.f32 %v66_v15, %v61_v12  ;;  %v68_v18 = vadd.f32 %v66_v15, %v58_v13  ;;  %v70_v19 = vadd.f32 %v66_v15, %v60_v14  ;;  %v83_v27 = vpop.permute.xlu1 %82 }
  0x92   :  { %v73_v20 = vmax.f32 %v69_v16, 0.0  ;;  %v75_v21 = vmax.f32 %v71_v17, 0.0  ;;  %v72_v22 = vmax.f32 %v68_v18, 0.0  ;;  %v74_v23 = vmax.f32 %v70_v19, 0.0 }
  0x94   :  { %127 = vmatprep.subr.mxu0 %v73_v20  ;;  %204 = vmatprep.subr.mxu1 %v75_v21 }
  0x95   :  { %128 = vmatpush1.msra.mxu0 %v72_v22  ;;  %205 = vmatpush1.msra.mxu1 %v74_v23 }
  0x96   :  { %1084 = vmatmul.mubr.msk.f32.vlgmr.msra.gmra.mxu0 %vm90_vm0, %v76_v24  ;;  %1086 = vmatmul.mubr.msk.f32.vlgmr.msra.gmra.mxu1 %vm90_vm0, %v76_v24 }
  0x97   :  { %167 = vmatprep.mubr.f32.mxu0 %v1810_v3  ;;  %244 = vmatprep.mubr.f32.mxu1 %v1810_v3 }
  0x9a   :  { %1085 = vmatmul.mubr.msk.f32.gmra.mxu0 %vm90_vm0, %v77_v25  ;;  %1087 = vmatmul.mubr.msk.f32.gmra.mxu1 %vm90_vm0, %v77_v25 }
  0x9b   :  { %1095 = vmatprep.mubr.msk.f32.mxu0 %vm724_vm2, %v709_v55  ;;  %1097 = vmatprep.mubr.msk.f32.mxu1 %vm724_vm2, %v709_v55 }
 0x156   :  { %v163_v28 = vpop.f32.mrf.mxu0  ;;  %v240_v29 = vpop.f32.mrf.mxu1 }
 0x157   :  { %v164_v30 = vadd.f32 %v163_v28, %v83_v27  ;;  %v241_v34 = vadd.f32 %v240_v29, %v83_v27 }
 0x158   :  { %v165_v31 = vpop.f32.mrf.mxu0  ;;  %v242_v32 = vpop.f32.mrf.mxu1 }
 0x159   :  { %v1277_v33 = vmax.f32 %v164_v30, 0.0  ;;  %v166_v35 = vadd.f32 %v165_v31, %v83_v27  ;;  %v243_v37 = vadd.f32 %v242_v32, %v83_v27  ;;  %v1283_v38 = vmax.f32 %v241_v34, 0.0 }
 0x15a   :  { %v169_v40 = vpop.f32.mrf.mxu0  ;;  %v246_v41 = vpop.f32.mrf.mxu1 }
 0x15b   :  { %v1279_v36 = vmax.f32 %v166_v35, 0.0  ;;  %596 = vrot.lane.b32.xlu0 %v1277_v33, %s1167_s10  ;;  %v1287_v39 = vmax.f32 %v243_v37, 0.0  ;;  %v170_v43 = vadd.f32 %v169_v40, %v88_v26  ;;  %v247_v47 = vadd.f32 %v246_v41, %v88_v26 }
 0x15c   :  { %v171_v42 = vpop.f32.mrf.mxu0  ;;  %v248_v45 = vpop.f32.mrf.mxu1 }
 0x15d   :  { %600 = vrot.lane.b32.xlu1 %v1279_v36, %s1167_s10  ;;  %v172_v44 = vadd.f32 %v171_v42, %v88_v26  ;;  %v1343_v46 = vmax.f32 %v170_v43, 0.0  ;;  %v249_v49 = vadd.f32 %v248_v45, %v88_v26  ;;  %v1351_v50 = vmax.f32 %v247_v47, 0.0 }
 0x15e   :  { %v289_v42 = vshrl.u32 %v275_v52, 7 }
 0x15f   :  { %604 = vrot.lane.b32.xlu0 %v1283_v38, %s1167_s10  ;;  %v1347_v48 = vmax.f32 %v172_v44, 0.0  ;;  %v1355_v51 = vmax.f32 %v249_v49, 0.0  ;;  %v1093_v49 = vld [vmem:[%s1808_s8 + $0x1c] sm:$0xf] }
 0x160   :  { %v1550_v44 = vsub.s32 1, %v289_v42  ;;  %v1552_v47 = vsub.s32 0, %v289_v42  ;;  %v1557_v55 = vsub.s32 2, %v289_v42 }
 0x161   :  { %608 = vrot.lane.b32.xlu1 %v1287_v39, %s1167_s10 }
 0x163   :  { %540 = vrot.lane.b32.xlu0 %v1277_v33, %s1168_s3 }
 0x165   :  { %544 = vrot.lane.b32.xlu1 %v1279_v36, %s1168_s3 }
 0x167   :  { %548 = vrot.lane.b32.xlu0 %v1283_v38, %s1168_s3 }
 0x169   :  { %552 = vrot.lane.b32.xlu1 %v1287_v39, %s1168_s3 }
 0x16b   :  { %484 = vrot.lane.b32.xlu0 %v1277_v33, %s1169_s11 }
 0x16d   :  { %488 = vrot.lane.b32.xlu1 %v1279_v36, %s1169_s11 }
 0x16f   :  { %492 = vrot.lane.b32.xlu0 %v1283_v38, %s1169_s11 }
 0x171   :  { %496 = vrot.lane.b32.xlu1 %v1287_v39, %s1169_s11 }
 0x173   :  { %428 = vrot.lane.b32.xlu0 %v1277_v33, %s1170_s14 }
 0x175   :  { %432 = vrot.lane.b32.xlu1 %v1279_v36, %s1170_s14 }
 0x177   :  { %436 = vrot.lane.b32.xlu0 %v1283_v38, %s1170_s14 }
 0x179   :  { %440 = vrot.lane.b32.xlu1 %v1287_v39, %s1170_s14 }
 0x17b   :  { %372 = vrot.lane.b32.xlu0 %v1277_v33, %s1171_s15 }
 0x17d   :  { %376 = vrot.lane.b32.xlu1 %v1279_v36, %s1171_s15 }
 0x17f   :  { %380 = vrot.lane.b32.xlu0 %v1283_v38, %s1171_s15 }
 0x181   :  { %384 = vrot.lane.b32.xlu1 %v1287_v39, %s1171_s15 }
 0x183   :  { %316 = vrot.lane.b32.xlu0 %v1277_v33, %s1164_s13 }
 0x185   :  { %320 = vrot.lane.b32.xlu1 %v1279_v36, %s1164_s13 }
 0x187   :  { %324 = vrot.lane.b32.xlu0 %v1283_v38, %s1164_s13 }
 0x189   :  { %328 = vrot.lane.b32.xlu1 %v1287_v39, %s1164_s13 }
 0x18b   :  { %259 = vrot.lane.b32.xlu0 %v1277_v33, %s1172_s16 }
 0x18d   :  { %263 = vrot.lane.b32.xlu1 %v1279_v36, %s1172_s16 }
 0x18f   :  { %267 = vrot.lane.b32.xlu0 %v1283_v38, %s1172_s16 }
 0x191   :  { %271 = vrot.lane.b32.xlu1 %v1287_v39, %s1172_s16 }
 0x193   :  { %652 = vrot.lane.b32.xlu0 %v1277_v33, %s1173_s17 }
 0x195   :  { %656 = vrot.lane.b32.xlu1 %v1279_v36, %s1173_s17 }
 0x197   :  { %598 = vrot.lane.b32.xlu0 %v1343_v46, %s1167_s10 }
 0x199   :  { %602 = vrot.lane.b32.xlu1 %v1347_v48, %s1167_s10 }
 0x19b   :  { %606 = vrot.lane.b32.xlu0 %v1351_v50, %s1167_s10 }
 0x19d   :  { %610 = vrot.lane.b32.xlu1 %v1355_v51, %s1167_s10 }
 0x19f   :  { %542 = vrot.lane.b32.xlu0 %v1343_v46, %s1168_s3 }
 0x1a1   :  { %546 = vrot.lane.b32.xlu1 %v1347_v48, %s1168_s3 }
 0x1a3   :  { %550 = vrot.lane.b32.xlu0 %v1351_v50, %s1168_s3 }
 0x1a5   :  { %554 = vrot.lane.b32.xlu1 %v1355_v51, %s1168_s3 }
 0x1a7   :  { %486 = vrot.lane.b32.xlu0 %v1343_v46, %s1169_s11 }
 0x1a9   :  { %490 = vrot.lane.b32.xlu1 %v1347_v48, %s1169_s11 }
 0x1ab   :  { %494 = vrot.lane.b32.xlu0 %v1351_v50, %s1169_s11 }
 0x1ad   :  { %498 = vrot.lane.b32.xlu1 %v1355_v51, %s1169_s11 }
 0x1af   :  { %430 = vrot.lane.b32.xlu0 %v1343_v46, %s1170_s14 }
 0x1b1   :  { %434 = vrot.lane.b32.xlu1 %v1347_v48, %s1170_s14 }
 0x1b3   :  { %438 = vrot.lane.b32.xlu0 %v1351_v50, %s1170_s14 }
 0x1b5   :  { %442 = vrot.lane.b32.xlu1 %v1355_v51, %s1170_s14 }
 0x1b7   :  { %374 = vrot.lane.b32.xlu0 %v1343_v46, %s1171_s15 }
 0x1b9   :  { %378 = vrot.lane.b32.xlu1 %v1347_v48, %s1171_s15 }
 0x1bb   :  { %382 = vrot.lane.b32.xlu0 %v1351_v50, %s1171_s15 }
 0x1bd   :  { %386 = vrot.lane.b32.xlu1 %v1355_v51, %s1171_s15  ;;  %s1174_s15 = smov [#allocation5]  }
 0x1bf   :  { %318 = vrot.lane.b32.xlu0 %v1343_v46, %s1164_s13 }
 0x1c1   :  { %322 = vrot.lane.b32.xlu1 %v1347_v48, %s1164_s13 }
 0x1c3   :  { %326 = vrot.lane.b32.xlu0 %v1351_v50, %s1164_s13 }
 0x1c5   :  { %330 = vrot.lane.b32.xlu1 %v1355_v51, %s1164_s13 }
 0x1c7   :  { %261 = vrot.lane.b32.xlu0 %v1343_v46, %s1172_s16 }
 0x1c9   :  { %265 = vrot.lane.b32.xlu1 %v1347_v48, %s1172_s16 }
 0x1cb   :  { %269 = vrot.lane.b32.xlu0 %v1351_v50, %s1172_s16 }
 0x1cd   :  { %273 = vrot.lane.b32.xlu1 %v1355_v51, %s1172_s16  ;;  %v1412_v54 = vpop.permute.xlu0 %596  ;;  %s1070_s16 = sshll.u32 %s1174_s15, 4  ;;  %s1071_s16 = int_to_ptr.vmem [resolvable:$true] %s1070_s16 }
 0x1ce   :  { %p1143_p6 = scmp.lt.s32.totalorder %s1071_s16, %s1071_s16 }
 0x1cf   :  { %v1417_v56 = vpop.permute.xlu1 %600  ;;  %654 = vrot.lane.b32.xlu0 %v1343_v46, %s1173_s17 }
 0x1d0   :  { %v1425_v57 = vsel %vm612_vm1, %v1412_v54, %v1417_v56 }
 0x1d1   :  { %658 = vrot.lane.b32.xlu1 %v1347_v48, %s1173_s17  ;;  %v1429_v58 = vpop.permute.xlu0 %604 }
 0x1d3   :  { %v1431_v59 = vpop.permute.xlu1 %608  ;;  %662 = vrot.lane.b32.xlu0 %v1351_v50, %s1173_s17 }
 0x1d4   :  { %v619_v6 = vsel %vm612_vm1, %v1431_v59, %v1412_v54 }
 0x1d5   :  { %666 = vrot.lane.b32.xlu1 %v1355_v51, %s1173_s17  ;;  %v1437_v60 = vpop.permute.xlu0 %540 }
 0x1d7   :  { %v1440_v61 = vpop.permute.xlu1 %544  ;;  %660 = vrot.lane.b32.xlu0 %v1283_v38, %s1173_s17 }
 0x1d8   :  { %v1448_v62 = vsel %vm556_vm3, %v1437_v60, %v1440_v61 }
 0x1d9   :  { %664 = vrot.lane.b32.xlu1 %v1287_v39, %s1173_s17  ;;  %v1455_v0 = vpop.permute.xlu0 %548 }
 0x1db   :  { %v1460_v2 = vpop.permute.xlu1 %552  ;;  %721 = vperm.xlu0 %1116, %v713_v63   ;;  %v1559_v63 = vsub.s32 3, %v289_v42  ;;  %v635_v42 = vrot.slane %v1093_v49, %v1557_v55 }
 0x1dd   :  { %716 = vperm.xlu1 %1117, %v712_v1   ;;  %v1462_v4 = vpop.permute.xlu0 %484  ;;  %v639_v10 = vrot.slane %v1093_v49, %v1559_v63 }
 0x1df   :  { %v1465_v5 = vpop.permute.xlu1 %488  ;;  %v647_v54 = vmul.f32 %v639_v10, %v619_v6  ;;  %v559_v6 = vsel %vm556_vm3, %v1440_v61, %v1455_v0 }
 0x1e0   :  { %v1471_v7 = vsel %vm500_vm4, %v1462_v4, %v1465_v5 }
 0x1e1   :  { %v1473_v11 = vpop.permute.xlu0 %492 }
 0x1e3   :  { %v1475_v12 = vpop.permute.xlu1 %496 }
 0x1e5   :  { %v1477_v13 = vpop.permute.xlu0 %428 }
 0x1e7   :  { %v433_v14 = vpop.permute.xlu1 %432 }
 0x1e8   :  { %v1483_v15 = vsel %vm444_vm5, %v1477_v13, %v433_v14 }
 0x1e9   :  { %v1485_v16 = vpop.permute.xlu0 %436 }
 0x1ea   :  { %v1490_v17 = vsel %vm444_vm5, %v433_v14, %v1485_v16  ;;  %v631_v14 = vrot.slane %v1093_v49, %v1550_v44 }
 0x1eb   :  { %v1492_v18 = vpop.permute.xlu1 %440 }
 0x1ed   :  { %v1494_v19 = vpop.permute.xlu0 %372 }
 0x1ef   :  { %v377_v20 = vpop.permute.xlu1 %376 }
 0x1f0   :  { %v1500_v21 = vsel %vm388_vm6, %v1494_v19, %v377_v20 }
 0x1f1   :  { %v1502_v22 = vpop.permute.xlu0 %380 }
 0x1f2   :  { %v1507_v23 = vsel %vm388_vm6, %v377_v20, %v1502_v22 }
 0x1f3   :  { %v1509_v24 = vpop.permute.xlu1 %384 }
 0x1f5   :  { %v1511_v25 = vpop.permute.xlu0 %316 }
 0x1f7   :  { %v321_v26 = vpop.permute.xlu1 %320 }
 0x1f8   :  { %v1517_v27 = vsel %vm332_vm7, %v1511_v25, %v321_v26 }
 0x1f9   :  { %v1519_v28 = vpop.permute.xlu0 %324 }
 0x1fa   :  { %v1524_v29 = vsel %vm332_vm7, %v321_v26, %v1519_v28  ;;  %v627_v26 = vrot.slane %v1093_v49, %v1552_v47  ;;  %v613_v49 = vsel %vm612_vm1, %v1429_v58, %v1431_v59 }
 0x1fb   :  { %v1526_v30 = vpop.permute.xlu1 %328 }
 0x1fd   :  { %v1528_v31 = vpop.permute.xlu0 %259 }
 0x1fe   :  { %1823 = vst [vmem:[#allocation12_spill] sm:$0xff] %v1528_v31 }
 0x1ff   :  { %v264_v32 = vpop.permute.xlu1 %263 }
 0x200   :  { %v1534_v34 = vsel %vm277_vm8, %v1528_v31, %v264_v32  ;;  %v644_v31 = vmul.f32 %v627_v26, %v1425_v57 }
 0x201   :  { %1824 = vst [vmem:[#allocation13_spill] sm:$0xff] %v1534_v34  ;;  %v1536_v35 = vpop.permute.xlu0 %267 }
 0x202   :  { %v1541_v37 = vsel %vm277_vm8, %v264_v32, %v1536_v35  ;;  %v615_v32 = vsel %vm612_vm1, %v1417_v56, %v1429_v58 }
 0x203   :  { %1825 = vst [vmem:[#allocation14_spill] sm:$0xff] %v1541_v37  ;;  %v1543_v40 = vpop.permute.xlu1 %271  ;;  %v645_v37 = vmul.f32 %v631_v14, %v615_v32 }
 0x205   :  { %v1545_v41 = vpop.permute.xlu0 %652 }
 0x206   :  { %1826 = vst [vmem:[#allocation15_spill] sm:$0xff] %v1545_v41 }
 0x207   :  { %v1548_v43 = vpop.permute.xlu1 %656 }
 0x208   :  { %1827 = vst [vmem:[#allocation16_spill] sm:$0xff] %v1548_v43 }
 0x209   :  { %v599_v45 = vpop.permute.xlu0 %598 }
 0x20b   :  { %v603_v1 = vpop.permute.xlu1 %602 }
 0x20c   :  { %v618_v52 = vsel %vm612_vm1, %v599_v45, %v603_v1 }
 0x20d   :  { %v607_v20 = vpop.permute.xlu0 %606  ;;  %v648_v41 = vmul.f32 %v627_v26, %v618_v52  ;;  %v1092_v52 = vld [vmem:[%s1808_s8 + $0x18] sm:$0xf] }
 0x20e   :  { %v616_v3 = vsel %vm612_vm1, %v603_v1, %v607_v20  ;;  %v575_v58 = vrot.slane %v1092_v52, %v1550_v44  ;;  %v571_v57 = vrot.slane %v1092_v52, %v1552_v47 }
 0x20f   :  { %v649_v8 = vmul.f32 %v631_v14, %v616_v3  ;;  %v611_v9 = vpop.permute.xlu1 %610 }
 0x210   :  { %v614_v43 = vsel %vm612_vm1, %v607_v20, %v611_v9  ;;  %v620_v56 = vsel %vm612_vm1, %v611_v9, %v599_v45  ;;  %v646_v9 = vmul.f32 %v635_v42, %v613_v49  ;;  %v563_v45 = vsel %vm556_vm3, %v1460_v2, %v1437_v60 }
 0x211   :  { %v650_v3 = vmul.f32 %v635_v42, %v614_v43  ;;  %v651_v1 = vmul.f32 %v639_v10, %v620_v56  ;;  %731 = vmatprep.subr.mxu0 %v649_v8  ;;  %v543_v34 = vpop.permute.xlu0 %542  ;;  %v589_v32 = vmul.f32 %v575_v58, %v559_v6  ;;  %v557_v42 = vsel %vm556_vm3, %v1455_v0, %v1460_v2 }
 0x212   :  { %732 = vmatpush1.msra.mxu0 %v648_v41 }
 0x213   :  { %v547_v20 = vpop.permute.xlu1 %546  ;;  %733 = vmatprep.subr.mxu0 %v645_v37  ;;  %808 = vmatprep.subr.mxu1 %v651_v1  ;;  %v583_v37 = vrot.slane %v1092_v52, %v1559_v63  ;;  %v588_v1 = vmul.f32 %v571_v57, %v1448_v62 }
 0x214   :  { %734 = vmatpush1.msra.mxu0 %v644_v31  ;;  %809 = vmatpush1.msra.mxu1 %v650_v3  ;;  %v562_v8 = vsel %vm556_vm3, %v543_v34, %v547_v20  ;;  %v579_v31 = vrot.slane %v1092_v52, %v1557_v55 }
 0x215   :  { %810 = vmatprep.subr.mxu1 %v647_v54  ;;  %v551_v59 = vpop.permute.xlu0 %550  ;;  %v592_v14 = vmul.f32 %v571_v57, %v562_v8  ;;  %v591_v60 = vmul.f32 %v583_v37, %v563_v45  ;;  %v1091_v54 = vld [vmem:[%s1808_s8 + $0x14] sm:$0xf] }
 0x216   :  { %v560_v10 = vsel %vm556_vm3, %v547_v20, %v551_v59  ;;  %811 = vmatpush1.msra.mxu1 %v646_v9  ;;  %v519_v0 = vrot.slane %v1091_v54, %v1550_v44  ;;  %v515_v62 = vrot.slane %v1091_v54, %v1552_v47  ;;  %v503_v9 = vsel %vm500_vm4, %v1465_v5, %v1473_v11 }
 0x217   :  { %v593_v41 = vmul.f32 %v575_v58, %v560_v10  ;;  %v555_v43 = vpop.permute.xlu1 %554  ;;  %v523_v8 = vrot.slane %v1091_v54, %v1557_v55  ;;  %v507_v10 = vsel %vm500_vm4, %v1475_v12, %v1462_v4  ;;  %v1090_v4 = vld [vmem:[%s1808_s8 + $0xc] sm:$0xf] }
 0x218   :  { %v558_v26 = vsel %vm556_vm3, %v551_v59, %v555_v43  ;;  %v564_v61 = vsel %vm556_vm3, %v555_v43, %v543_v34  ;;  %v590_v34 = vmul.f32 %v579_v31, %v557_v42  ;;  %v527_v59 = vrot.slane %v1091_v54, %v1559_v63 }
 0x219   :  { %v594_v56 = vmul.f32 %v579_v31, %v558_v26  ;;  %v595_v49 = vmul.f32 %v583_v37, %v564_v61  ;;  %735 = vmatprep.subr.mxu0 %v593_v41  ;;  %v487_v3 = vpop.permute.xlu0 %486  ;;  %v533_v41 = vmul.f32 %v519_v0, %v503_v9  ;;  %v501_v43 = vsel %vm500_vm4, %v1473_v11, %v1475_v12 }
 0x21a   :  { %736 = vmatpush1.msra.mxu0 %v592_v14  ;;  %v532_v61 = vmul.f32 %v515_v62, %v1471_v7  ;;  %v463_v11 = vrot.slane %v1090_v4, %v1550_v44  ;;  %v467_v12 = vrot.slane %v1090_v4, %v1557_v55 }
 0x21b   :  { %v491_v52 = vpop.permute.xlu1 %490  ;;  %737 = vmatprep.subr.mxu0 %v589_v32  ;;  %812 = vmatprep.subr.mxu1 %v595_v49  ;;  %v535_v32 = vmul.f32 %v527_v59, %v507_v10  ;;  %v395_v10 = vsel %vm388_vm6, %v1509_v24, %v1494_v19 }
 0x21c   :  { %738 = vmatpush1.msra.mxu0 %v588_v1  ;;  %813 = vmatpush1.msra.mxu1 %v594_v56  ;;  %v506_v2 = vsel %vm500_vm4, %v487_v3, %v491_v52  ;;  %v534_v56 = vmul.f32 %v523_v8, %v501_v43  ;;  %v471_v1 = vrot.slane %v1090_v4, %v1559_v63 }
 0x21d   :  { %814 = vmatprep.subr.mxu1 %v591_v60  ;;  %v495_v20 = vpop.permute.xlu0 %494  ;;  %v536_v31 = vmul.f32 %v515_v62, %v506_v2  ;;  %v445_v60 = vsel %vm444_vm5, %v1485_v16, %v1492_v18 }
 0x21e   :  { %v504_v58 = vsel %vm500_vm4, %v491_v52, %v495_v20  ;;  %815 = vmatpush1.msra.mxu1 %v590_v34  ;;  %v1089_v34 = vld [vmem:[%s1808_s8 + $0x8] sm:$0xf]  ;;  %v479_v62 = vmul.f32 %v471_v1, %v445_v60 }
 0x21f   :  { %v537_v57 = vmul.f32 %v519_v0, %v504_v58  ;;  %v499_v6 = vpop.permute.xlu1 %498  ;;  %v407_v9 = vrot.slane %v1089_v34, %v1550_v44 }
 0x220   :  { %v502_v37 = vsel %vm500_vm4, %v495_v20, %v499_v6  ;;  %v508_v5 = vsel %vm500_vm4, %v499_v6, %v487_v3  ;;  %v459_v3 = vrot.slane %v1090_v4, %v1552_v47  ;;  %v389_v6 = vsel %vm388_vm6, %v1502_v22, %v1509_v24 }
 0x221   :  { %v538_v45 = vmul.f32 %v523_v8, %v502_v37  ;;  %v539_v14 = vmul.f32 %v527_v59, %v508_v5  ;;  %739 = vmatprep.subr.mxu0 %v537_v57  ;;  %v431_v26 = vpop.permute.xlu0 %430  ;;  %v403_v8 = vrot.slane %v1089_v34, %v1552_v47  ;;  %v415_v59 = vrot.slane %v1089_v34, %v1559_v63 }
 0x222   :  { %740 = vmatpush1.msra.mxu0 %v536_v31  ;;  %v1088_v31 = vld [vmem:[%s1808_s8 + $0x4] sm:$0xf]  ;;  %v421_v22 = vmul.f32 %v407_v9, %v1500_v21 }
 0x223   :  { %v435_v42 = vpop.permute.xlu1 %434  ;;  %741 = vmatprep.subr.mxu0 %v533_v41  ;;  %816 = vmatprep.subr.mxu1 %v539_v14  ;;  %v351_v19 = vrot.slane %v1088_v31, %v1550_v44  ;;  %v355_v21 = vrot.slane %v1088_v31, %v1557_v55 }
 0x224   :  { %v450_v49 = vsel %vm444_vm5, %v431_v26, %v435_v42  ;;  %742 = vmatpush1.msra.mxu0 %v532_v61  ;;  %817 = vmatpush1.msra.mxu1 %v538_v45  ;;  %v423_v61 = vmul.f32 %v415_v59, %v389_v6 }
 0x225   :  { %743 = vmatprep.subr.mxu0 %v1347_v48  ;;  %818 = vmatprep.subr.mxu1 %v535_v32  ;;  %v439_v7 = vpop.permute.xlu0 %438  ;;  %v481_v54 = vmul.f32 %v463_v11, %v450_v49  ;;  %v347_v49 = vrot.slane %v1088_v31, %v1552_v47 }
 0x226   :  { %744 = vmatpush1.msra.mxu0 %v1343_v46  ;;  %819 = vmatpush1.msra.mxu1 %v534_v56  ;;  %v448_v48 = vsel %vm444_vm5, %v435_v42, %v439_v7  ;;  %v451_v46 = vsel %vm444_vm5, %v1492_v18, %v1477_v13  ;;  %v477_v18 = vmul.f32 %v463_v11, %v1483_v15 }
 0x227   :  { %v443_v52 = vpop.permute.xlu1 %442  ;;  %745 = vmatprep.subr.mxu0 %v1279_v36  ;;  %820 = vmatprep.subr.mxu1 %v1355_v51  ;;  %v482_v2 = vmul.f32 %v467_v12, %v448_v48  ;;  %v476_v20 = vmul.f32 %v459_v3, %v451_v46  ;;  %v359_v11 = vrot.slane %v1088_v31, %v1559_v63 }
 0x228   :  { %v446_v16 = vsel %vm444_vm5, %v439_v7, %v443_v52  ;;  %v452_v0 = vsel %vm444_vm5, %v443_v52, %v431_v26  ;;  %746 = vmatpush1.msra.mxu0 %v1277_v33  ;;  %821 = vmatpush1.msra.mxu1 %v1351_v50  ;;  %v478_v33 = vmul.f32 %v467_v12, %v1490_v17 }
 0x229   :  { %v480_v36 = vmul.f32 %v459_v3, %v452_v0  ;;  %v483_v51 = vmul.f32 %v471_v1, %v446_v16  ;;  %747 = vmatprep.subr.mxu0 %v481_v54  ;;  %822 = vmatprep.subr.mxu1 %v1287_v39  ;;  %v375_v13 = vpop.permute.xlu0 %374  ;;  %v420_v26 = vmul.f32 %v403_v8, %v395_v10  ;;  %v286_v1 = vld [vmem:[%s1808_s8] sm:$0xf] }
 0x22a   :  { %823 = vmatpush1.msra.mxu1 %v1283_v38  ;;  %v411_v38 = vrot.slane %v1089_v34, %v1557_v55  ;;  %v333_v12 = vsel %vm332_vm7, %v1519_v28, %v1526_v30  ;;  %v339_v3 = vsel %vm332_vm7, %v1526_v30, %v1511_v25  ;;  %v365_v28 = vmul.f32 %v351_v19, %v1517_v27 }
 0x22b   :  { %v379_v58 = vpop.permute.xlu1 %378  ;;  %748 = vmatpush1.msra.mxu0 %v480_v36  ;;  %824 = vmatprep.subr.mxu1 %v483_v51  ;;  %v364_v16 = vmul.f32 %v347_v49, %v339_v3  ;;  %v367_v0 = vmul.f32 %v359_v11, %v333_v12  ;;  %v295_v25 = vrot.slane %v286_v1, %v1550_v44  ;;  %v708_v3 = vld [vmem:[#allocation2] sm:$0xff] }
 0x22c   :  { %v394_v50 = vsel %vm388_vm6, %v375_v13, %v379_v58  ;;  %749 = vmatprep.subr.mxu0 %v477_v18  ;;  %825 = vmatpush1.msra.mxu1 %v482_v2  ;;  %v422_v4 = vmul.f32 %v411_v38, %v1507_v23  ;;  %v366_v36 = vmul.f32 %v355_v21, %v1524_v29 }
 0x22d   :  { %v425_v39 = vmul.f32 %v407_v9, %v394_v50  ;;  %750 = vmatpush1.msra.mxu0 %v476_v20  ;;  %826 = vmatprep.subr.mxu1 %v479_v62  ;;  %v383_v15 = vpop.permute.xlu0 %382  ;;  %v299_v27 = vrot.slane %v286_v1, %v1557_v55  ;;  %v291_v2 = vrot.slane %v286_v1, %v1552_v47 }
 0x22e   :  { %827 = vmatpush1.msra.mxu1 %v478_v33  ;;  %v392_v57 = vsel %vm388_vm6, %v379_v58, %v383_v15  ;;  %v303_v20 = vrot.slane %v286_v1, %v1559_v63  ;;  %v278_v9 = vsel %vm277_vm8, %v1536_v35, %v1543_v40  ;;  %v1828_v58 = vld [vmem:[#allocation12_spill] sm:$0xff] }
 0x22f   :  { %v387_v17 = vpop.permute.xlu1 %386  ;;  %751 = vmatprep.subr.mxu0 %v425_v39  ;;  %v426_v14 = vmul.f32 %v411_v38, %v392_v57  ;;  %v284_v33 = vsel %vm277_vm8, %v1543_v40, %v1828_v58  ;;  %v1094_v35 = vld [vmem:[%s1808_s8 + $0x20] sm:$0xf] }
 0x230   :  { %v390_v37 = vsel %vm388_vm6, %v383_v15, %v387_v17  ;;  %v396_v5 = vsel %vm388_vm6, %v387_v17, %v375_v13  ;;  %v308_v6 = vmul.f32 %v291_v2, %v284_v33  ;;  %v311_v10 = vmul.f32 %v303_v20, %v278_v9 }
 0x231   :  { %v424_v41 = vmul.f32 %v403_v8, %v396_v5  ;;  %v427_v43 = vmul.f32 %v415_v59, %v390_v37  ;;  %v319_v45 = vpop.permute.xlu0 %318  ;;  %v1829_v59 = vld [vmem:[#allocation13_spill] sm:$0xff]  ;;  %v687_v40 = vrot.slane %v1094_v35, %v1550_v44  ;;  %v1830_v37 = vld [vmem:[#allocation14_spill] sm:$0xff] }
 0x232   :  { %v309_v57 = vmul.f32 %v295_v25, %v1829_v59  ;;  %v310_v5 = vmul.f32 %v299_v27, %v1830_v37 }
 0x233   :  { %v323_v24 = vpop.permute.xlu1 %322  ;;  %752 = vmatpush1.msra.mxu0 %v424_v41  ;;  %828 = vmatprep.subr.mxu1 %v427_v43 }
 0x234   :  { %v338_v32 = vsel %vm332_vm7, %v319_v45, %v323_v24  ;;  %753 = vmatprep.subr.mxu0 %v421_v22  ;;  %829 = vmatpush1.msra.mxu1 %v426_v14  ;;  %v695_v22 = vrot.slane %v1094_v35, %v1559_v63  ;;  %v683_v14 = vrot.slane %v1094_v35, %v1552_v47 }
 0x235   :  { %v369_v42 = vmul.f32 %v351_v19, %v338_v32  ;;  %754 = vmatpush1.msra.mxu0 %v420_v26  ;;  %830 = vmatprep.subr.mxu1 %v423_v61  ;;  %v327_v56 = vpop.permute.xlu0 %326  ;;  %v1831_v32 = vld [vmem:[#allocation16_spill] sm:$0xff] }
 0x236   :  { %831 = vmatpush1.msra.mxu1 %v422_v4  ;;  %v336_v7 = vsel %vm332_vm7, %v323_v24, %v327_v56 }
 0x237   :  { %v331_v23 = vpop.permute.xlu1 %330  ;;  %755 = vmatprep.subr.mxu0 %v369_v42  ;;  %v370_v34 = vmul.f32 %v355_v21, %v336_v7  ;;  %v1832_v42 = vld [vmem:[#allocation15_spill] sm:$0xff] }
 0x238   :  { %v334_v60 = vsel %vm332_vm7, %v327_v56, %v331_v23  ;;  %v340_v54 = vsel %vm332_vm7, %v331_v23, %v319_v45  ;;  %v691_v45 = vrot.slane %v1094_v35, %v1557_v55  ;;  %v673_v55 = vsel %vm668_vm9, %v1832_v42, %v1831_v32 }
 0x239   :  { %v368_v48 = vmul.f32 %v347_v49, %v340_v54  ;;  %v371_v52 = vmul.f32 %v359_v11, %v334_v60  ;;  %v262_v46 = vpop.permute.xlu0 %261  ;;  %v700_v7 = vmul.f32 %v683_v14, %v673_v55  ;;  %v711_v54 = vld [vmem:[#allocation2 + $0x18] sm:$0xff] }
 0x23b   :  { %v266_v30 = vpop.permute.xlu1 %265  ;;  %756 = vmatpush1.msra.mxu0 %v368_v48  ;;  %832 = vmatprep.subr.mxu1 %v371_v52  ;;  %v710_v48 = vld [vmem:[#allocation2 + $0x10] sm:$0xff]  ;;  %v1833_v52 = vld [vmem:[#allocation8_spill] sm:$0xff] }
 0x23c   :  { %v283_v51 = vsel %vm277_vm8, %v262_v46, %v266_v30  ;;  %757 = vmatprep.subr.mxu0 %v365_v28  ;;  %833 = vmatpush1.msra.mxu1 %v370_v34  ;;  %v1836_v28 = vld [vmem:[#allocation11_spill] sm:$0xff]  ;;  %v1837_v34 = vmov 0.0  }
 0x23d   :  { %v313_v13 = vmul.f32 %v295_v25, %v283_v51  ;;  %758 = vmatpush1.msra.mxu0 %v364_v16  ;;  %834 = vmatprep.subr.mxu1 %v367_v0  ;;  %v270_v18 = vpop.permute.xlu0 %269 }
 0x23e   :  { %835 = vmatpush1.msra.mxu1 %v366_v36  ;;  %v281_v62 = vsel %vm277_vm8, %v266_v30, %v270_v18 }
 0x23f   :  { %v274_v29 = vpop.permute.xlu1 %273  ;;  %759 = vmatprep.subr.mxu0 %v313_v13  ;;  %v314_v17 = vmul.f32 %v299_v27, %v281_v62 }
 0x240   :  { %v279_v50 = vsel %vm277_vm8, %v270_v18, %v274_v29  ;;  %v285_v39 = vsel %vm277_vm8, %v274_v29, %v262_v46  ;;  %v1835_v46 = vld [vmem:[#allocation9_spill] sm:$0xff] }
 0x241   :  { %v312_v15 = vmul.f32 %v291_v2, %v285_v39  ;;  %v315_v38 = vmul.f32 %v303_v20, %v279_v50  ;;  %v655_v8 = vpop.permute.xlu0 %654 }
 0x243   :  { %v659_v31 = vpop.permute.xlu1 %658  ;;  %760 = vmatpush1.msra.mxu0 %v312_v15  ;;  %836 = vmatprep.subr.mxu1 %v315_v38 }
 0x244   :  { %761 = vmatprep.subr.mxu0 %v309_v57  ;;  %837 = vmatpush1.msra.mxu1 %v314_v17  ;;  %v674_v41 = vsel %vm668_vm9, %v655_v8, %v659_v31  ;;  %v893_v17 = vld [vmem:[%s1807_s7] sm:$0xff] }
 0x245   :  { %762 = vmatpush1.msra.mxu0 %v308_v6  ;;  %838 = vmatprep.subr.mxu1 %v311_v10  ;;  %v663_v43 = vpop.permute.xlu0 %662  ;;  %v704_v19 = vmul.f32 %v683_v14, %v674_v41 }
 0x246   :  { %v672_v44 = vsel %vm668_vm9, %v659_v31, %v663_v43  ;;  %839 = vmatpush1.msra.mxu1 %v310_v5  ;;  %v894_v31 = vld [vmem:[%s1807_s7 + $0x8] sm:$0xff]  ;;  %s1138_s7 = scalar_lea.vmem %s1071_s16, 1024 }
 0x247   :  { %v705_v26 = vmul.f32 %v687_v40, %v672_v44  ;;  %v667_v61 = vpop.permute.xlu1 %666  ;;  %p1139_p5 = scmp.ne.s32.totalorder %s1071_s16, %s1138_s7  ;;  %p1144_p7 = scmp.lt.s32.totalorder %s1138_s7, %s1138_s7 }
 0x248   :  { %v670_v24 = vsel %vm668_vm9, %v663_v43, %v667_v61  ;;  %v676_v4 = vsel %vm668_vm9, %v667_v61, %v655_v8 }
 0x249   :  { %v706_v63 = vmul.f32 %v691_v45, %v670_v24  ;;  %v707_v47 = vmul.f32 %v695_v22, %v676_v4  ;;  %791 = vmatprep.subr.mxu0 %v705_v26  ;;  %v661_v56 = vpop.permute.xlu0 %660  ;;  %p1145_p8 = por %p1144_p7, %p1143_p6 }
 0x24a   :  { %v671_v21 = vsel %vm668_vm9, %v1831_v32, %v661_v56  ;;  %792 = vmatpush2.msra.mxu0 %v704_v19 }
 0x24b   :  { %v701_v49 = vmul.f32 %v687_v40, %v671_v21  ;;  %v665_v11 = vpop.permute.xlu1 %664  ;;  %868 = vmatprep.subr.mxu1 %v707_v47  ;;  %p1146_p9 = pnand %p1145_p8, %p1139_p5 }
 0x24c   :  { %v669_v23 = vsel %vm668_vm9, %v661_v56, %v665_v11  ;;  %v675_v12 = vsel %vm668_vm9, %v665_v11, %v1832_v42  ;;  %869 = vmatpush2.msra.mxu1 %v706_v63 }
 0x24d   :  { %v702_v1 = vmul.f32 %v691_v45, %v669_v23  ;;  %v703_v60 = vmul.f32 %v695_v22, %v675_v12  ;;  %793 = vmatprep.subr.mxu0 %v701_v49 }
 0x24e   :  { %794 = vmatpush2.msra.mxu0 %v700_v7 }
 0x24f   :  { %796 = vmatmul.mubr.f32.vlgmr.msra.gmra.mxu0 %v708_v3  ;;  %870 = vmatprep.subr.mxu1 %v703_v60 }
 0x250   :  { %871 = vmatpush2.msra.mxu1 %v702_v1  ;;  %1096 = vmatprep.mubr.msk.f32.mxu0 %vm724_vm2, %v711_v54 }
 0x251   :  { %873 = vmatmul.mubr.f32.vlgmr.msra.gmra.mxu1 %v708_v3  ;;  %928 = vmatprep.subr.mxu0 %v1833_v52 }
 0x252   :  { %1098 = vmatprep.mubr.msk.f32.mxu1 %vm724_vm2, %v711_v54  ;;  %929 = vmatpush1.msra.mxu0 %v1834_v53 }
 0x253   :  { %802 = vmatmul.mubr.f32.gmra.mxu0 %v710_v48  ;;  %1005 = vmatprep.subr.mxu1 %v1835_v46 }
 0x254   :  { %1006 = vmatpush1.msra.mxu1 %v1836_v28  ;;  %966 = vmatprep.mubr.f32.mxu0 %v1837_v34 }
 0x255   :  { %879 = vmatmul.mubr.f32.gmra.mxu1 %v710_v48 }
 0x256   :  { %1043 = vmatprep.mubr.f32.mxu1 %v1837_v34  ;;  %v722_v51 = vpop.permute.xlu0 %721 }
 0x258   :  { %v717_v13 = vpop.permute.xlu1 %716 }
 0x30f   :  { %v797_v16 = vpop.f32.mrf.mxu0 }
 0x310   :  { %v798_v29 = vadd.f32 %v797_v16, %v717_v13 }
 0x311   :  { %v799_v0 = vpop.f32.mrf.mxu0  ;;  %v874_v25 = vpop.f32.mrf.mxu1 }
 0x312   :  { %v800_v20 = vadd.f32 %v799_v0, %v717_v13  ;;  %v875_v15 = vadd.f32 %v874_v25, %v717_v13  ;;  %v885_v57 = vmax.f32 %v798_v29, 0.0 }
 0x313   :  { %v803_v30 = vpop.f32.mrf.mxu0  ;;  %v876_v36 = vpop.f32.mrf.mxu1 }
 0x314   :  { %v804_v18 = vadd.f32 %v803_v30, %v722_v51  ;;  %v877_v33 = vadd.f32 %v876_v36, %v717_v13  ;;  %v886_v8 = vmax.f32 %v800_v20, 0.0  ;;  %v887_v10 = vmax.f32 %v875_v15, 0.0 }
 0x315   :  { %v805_v27 = vpop.f32.mrf.mxu0  ;;  %v880_v2 = vpop.f32.mrf.mxu1 }
 0x316   :  { %v806_v62 = vadd.f32 %v805_v27, %v722_v51  ;;  %v881_v9 = vadd.f32 %v880_v2, %v722_v51  ;;  %v889_v38 = vmax.f32 %v804_v18, 0.0  ;;  %v888_v6 = vmax.f32 %v877_v33, 0.0 }
 0x317   :  { %v882_v58 = vpop.f32.mrf.mxu1 }
 0x318   :  { %v890_v50 = vmax.f32 %v806_v62, 0.0  ;;  %v883_v39 = vadd.f32 %v882_v58, %v722_v51  ;;  %v891_v35 = vmax.f32 %v881_v9, 0.0 }
 0x31a   :  { %v892_v59 = vmax.f32 %v883_v39, 0.0  ;;  %930 = vmatprep.subr.mxu0 %v890_v50 }
 0x31b   :  { %931 = vmatpush1.msra.mxu0 %v889_v38 }
 0x31c   :  { %932 = vmatprep.subr.mxu0 %v886_v8  ;;  %1007 = vmatprep.subr.mxu1 %v892_v59 }
 0x31d   :  { %933 = vmatpush1.msra.mxu0 %v885_v57  ;;  %1008 = vmatpush1.msra.mxu1 %v891_v35 }
 0x31e   :  { %1009 = vmatprep.subr.mxu1 %v888_v6  ;;  %1099 = vmatmul.mubr.msk.f32.vlgmr.msra.gmra.mxu0 %vm895_vm10, %v893_v17 }
 0x31f   :  { %1010 = vmatpush1.msra.mxu1 %v887_v10  ;;  %972 = vmatprep.mubr.f32.mxu0 %v1837_v34 }
 0x320   :  { %1101 = vmatmul.mubr.msk.f32.vlgmr.msra.gmra.mxu1 %vm895_vm10, %v893_v17 }
 0x321   :  { %1049 = vmatprep.mubr.f32.mxu1 %v1837_v34 }
 0x322   :  { %1100 = vmatmul.mubr.msk.f32.gmra.mxu0 %vm895_vm10, %v894_v31 }
 0x324   :  { %1102 = vmatmul.mubr.msk.f32.gmra.mxu1 %vm895_vm10, %v894_v31 }
 0x3de   :  { %v968_v40 = vpop.f32.mrf.mxu0 }
 0x3df   :  { %1056 = vst [vmem:[#allocation5] sm:$0xff] %v968_v40 }
 0x3e0   :  { %v1045_v37 = vpop.f32.mrf.mxu1  ;;  %v970_v5 = vpop.f32.mrf.mxu0 }
 0x3e1   :  { %1061 = vst [vmem:[#allocation5 + $0x20] sm:$0xff] %v1045_v37  ;;  %1057 = vst [vmem:[#allocation5 + $0x8] sm:$0xff] %v970_v5 }
 0x3e2   :  { %v1047_v41 = vpop.f32.mrf.mxu1  ;;  %v974_v43 = vpop.f32.mrf.mxu0 }
 0x3e3   :  { %1062 = vst [vmem:[#allocation5 + $0x28] sm:$0xff] %v1047_v41  ;;  %1058 = vst [vmem:[#allocation5 + $0x10] sm:$0xff] %v974_v43 }
 0x3e4   :  { %v1051_v45 = vpop.f32.mrf.mxu1  ;;  %v976_v22 = vpop.f32.mrf.mxu0 }
 0x3e5   :  { %1063 = vst [vmem:[#allocation5 + $0x30] sm:$0xff] %v1051_v45  ;;  %1059 = vst [vmem:[#allocation5 + $0x18] sm:$0xff] %v976_v22 }
 0x3e6   :  { %v1053_v14 = vpop.f32.mrf.mxu1 }
 0x3e7   :  { %1064 = vst [vmem:[#allocation5 + $0x38] sm:$0xff] %v1053_v14 }
 0x3e8   :  { %1149 = shalt.err (!%p1146_p9)
}
 0x3e9   :  { %1076 = dma.vmem_to_hbm [thread:$0]  %s1071_s16, 1024, %s1809_s9, [#allocation4], %s1163_s12, %s1163_s12, %s1164_s13  }
 0x3ea   :  { %1160 = dma.done.wait [#allocation4], 1024  }
 0x3eb   :  { %1161 = vsyncadd [#allocation4], 4294966272 }
 0x3ec   :  { %1080 = vsyncpa [#allocation3], 1 }
 0x3ed   :  { %1081 = vsyncpa [#allocation4], 1 }

</bundles_post_ra>
